<compile_context>
chip_gen: v7x
topology: tpu7x:2x2x1
jax: 0.10.0
libtpu: 0.0.40
codegen_flags: <defaults>
</compile_context>

<pallas_src>
import functools

import jax
import jax.numpy as jnp
from jax.experimental import pallas as pl
from jax.experimental.pallas import tpu as pltpu

SELU_ALPHA = 1.6732632423543772
SELU_SCALE = 1.0507009873554805


def _selu(x):
    return SELU_SCALE * jnp.where(x > 0, x, SELU_ALPHA * (jnp.exp(x) - 1.0))


# ---------------------------------------------------------------------------
# One GATConv (single head, edge_dim folded to a scalar) on one graph.
# ---------------------------------------------------------------------------
def _gat(x, adj_mask, ea_scaled, w, att_src, att_dst, bias):
    # h = lin_src(x) == lin_dst(x)
    h = jnp.dot(x, w, preferred_element_type=jnp.float32)           # [N, F]

    # attention logits: alpha_dst[i] + alpha_src[j] + c_edge * edge_attr[i, j]
    a_dst = jnp.sum(h * att_dst, axis=-1, keepdims=True)            # [N, 1]
    # [1,F] x [N,F]^T -> [1,N].  MXU is otherwise idle at this point, which is
    # cheaper/safer than a VPU reduce followed by an explicit XLU transpose.
    a_src = jax.lax.dot_general(att_src, h, (((1,), (1,)), ((), ())),
                                preferred_element_type=jnp.float32)  # [1, N]
    logits = a_dst + a_src + ea_scaled                               # [N, N]

    # leaky_relu(negative_slope=0.2), then mask non-edges (mask reused).
    logits = jnp.where(logits > 0, logits, 0.2 * logits)
    logits = jnp.where(adj_mask, logits, jnp.float32(-1e30))

    # softmax over incoming edges (every row has a self-loop -> denom > 0)
    m = jnp.max(logits, axis=-1, keepdims=True)
    p = jnp.where(adj_mask, jnp.exp(logits - m), 0.0)
    denom = jnp.sum(p, axis=-1, keepdims=True)
    alpha = p * pl.reciprocal(denom, approx=True)                    # EUP slot

    return jnp.dot(alpha, h, preferred_element_type=jnp.float32) + bias


# ---------------------------------------------------------------------------
# Fused kernel: conv1 -> selu -> conv2 -> selu -> x1 -> selu -> x2 -> mask
# (one graph per grid step; all intermediates stay in VMEM)
# ---------------------------------------------------------------------------
def _gcn_kernel(ce_ref, x_ref, adj_ref, ea_ref,
                w1_ref, as1_ref, ad1_ref, b1_ref,
                w2_ref, as2_ref, ad2_ref, b2_ref,
                wx1_ref, bx1_ref, wx2_ref, bx2_ref,
                mask_ref, o_ref, *, num_nodes, conv2_out):
    adj_mask = adj_ref[0] > 0.0          # computed once, reused by both layers
    ea = ea_ref[0]

    # conv1 + selu
    h1 = _gat(x_ref[0], adj_mask, ea * ce_ref[0, 0],
              w1_ref[...], as1_ref[...], ad1_ref[...], b1_ref[...])
    h1 = _selu(h1)

    # conv2
    h2 = _gat(h1, adj_mask, ea * ce_ref[0, 1],
              w2_ref[...], as2_ref[...], ad2_ref[...], b2_ref[...])

    # MLP head: selu -> x1 -> selu -> x2 -> mask fill(-inf)
    conv_out = _selu(h2)                                  # [N, F2]
    wx1 = wx1_ref[...]                                    # [N*F2, N]
    # Row-major flatten @ wx1, expressed as N unrolled tiny matmuls so we never
    # need an in-kernel (N, F2) -> (1, N*F2) sublane->lane relayout.
    acc = bx1_ref[...]                                    # [1, N]
    for n in range(num_nodes):
        acc = acc + jnp.dot(conv_out[n:n + 1, :],
                            wx1[n * conv2_out:(n + 1) * conv2_out, :],
                            preferred_element_type=jnp.float32)
    y = _selu(acc)
    y = jnp.dot(y, wx2_ref[...], preferred_element_type=jnp.float32) + bx2_ref[...]
    o_ref[0] = jnp.where(mask_ref[0] > 0, y,
                         jnp.float32(-jnp.inf)).astype(o_ref.dtype)


def gcn_forward(x_nodes, adj, ea, params, mask):
    B, N, Fin = x_nodes.shape
    F1 = params["w_g1"].shape[1]
    F2 = params["w_g2"].shape[1]
    out_dim = params["w_x2"].shape[1]

    c_edges = jnp.concatenate(
        [params["c_edge1"].reshape(1, 1), params["c_edge2"].reshape(1, 1)],
        axis=1).astype(jnp.float32)                              # [1, 2] SMEM
    mask3 = mask.astype(jnp.int32).reshape(B, 1, out_dim)

    kernel = functools.partial(_gcn_kernel, num_nodes=N, conv2_out=F2)

    y = pl.pallas_call(
        kernel,
        out_shape=jax.ShapeDtypeStruct((B, 1, out_dim), jnp.float32),
        grid=(B,),
        in_specs=[
            pl.BlockSpec((1, 2), lambda b: (0, 0),
                         memory_space=pltpu.MemorySpace.SMEM),   # c_edge1/2
            pl.BlockSpec((1, N, Fin), lambda b: (b, 0, 0)),      # x
            pl.BlockSpec((1, N, N), lambda b: (b, 0, 0)),        # adj
            pl.BlockSpec((1, N, N), lambda b: (b, 0, 0)),        # edge attr
            pl.BlockSpec((Fin, F1), lambda b: (0, 0)),           # conv1 lin W
            pl.BlockSpec((1, F1), lambda b: (0, 0)),             # att_src1
            pl.BlockSpec((1, F1), lambda b: (0, 0)),             # att_dst1
            pl.BlockSpec((1, F1), lambda b: (0, 0)),             # bias1
            pl.BlockSpec((F1, F2), lambda b: (0, 0)),            # conv2 lin W
            pl.BlockSpec((1, F2), lambda b: (0, 0)),             # att_src2
            pl.BlockSpec((1, F2), lambda b: (0, 0)),             # att_dst2
            pl.BlockSpec((1, F2), lambda b: (0, 0)),             # bias2
            pl.BlockSpec((N * F2, N), lambda b: (0, 0)),         # x1 weight
            pl.BlockSpec((1, N), lambda b: (0, 0)),              # x1 bias
            pl.BlockSpec((N, out_dim), lambda b: (0, 0)),        # x2 weight
            pl.BlockSpec((1, out_dim), lambda b: (0, 0)),        # x2 bias
            pl.BlockSpec((1, 1, out_dim), lambda b: (b, 0, 0)),  # action mask
        ],
        out_specs=pl.BlockSpec((1, 1, out_dim), lambda b: (b, 0, 0)),
        compiler_params=pltpu.CompilerParams(
            dimension_semantics=("parallel",)),   # v7x: one graph per TC
    )(c_edges, x_nodes, adj, ea,
      params["w_g1"], params["att_src1"], params["att_dst1"], params["bias1"],
      params["w_g2"], params["att_src2"], params["att_dst2"], params["bias2"],
      params["w_x1"], params["b_x1"], params["w_x2"], params["b_x2"], mask3)
    return y.reshape(B, out_dim)


# ---------------------------------------------------------------------------
# Pure-JAX reference (exact reciprocal) for a correctness check.
# ---------------------------------------------------------------------------
def _reference_forward(x, adj, ea, params, mask):
    def gat(h_in, w, att_src, att_dst, c_edge, bias):
        h = h_in @ w
        a_dst = jnp.sum(h * att_dst[0], -1, keepdims=True)
        a_src = jnp.sum(h * att_src[0], -1)[:, None, :]
        logits = a_dst + a_src + ea * c_edge[0, 0]
        logits = jnp.where(logits > 0, logits, 0.2 * logits)
        logits = jnp.where(adj > 0, logits, -1e30)
        logits = logits - logits.max(-1, keepdims=True)
        p = jnp.where(adj > 0, jnp.exp(logits), 0.0)
        alpha = p / p.sum(-1, keepdims=True)
        return jnp.einsum("bij,bjf->bif", alpha, h) + bias[0]

    h1 = jax.nn.selu(gat(x, params["w_g1"], params["att_src1"],
                         params["att_dst1"], params["c_edge1"], params["bias1"]))
    h2 = gat(h1, params["w_g2"], params["att_src2"],
             params["att_dst2"], params["c_edge2"], params["bias2"])
    conv_out = jax.nn.selu(h2.reshape(h2.shape[0], -1))
    y = jax.nn.selu(conv_out @ params["w_x1"] + params["b_x1"][0])
    y = y @ params["w_x2"] + params["b_x2"][0]
    return jnp.where(mask, y, -jnp.inf)


# ---------------------------------------------------------------------------
# Deterministic graph + parameter construction
# ---------------------------------------------------------------------------
def build_batched_graph(key, B, N):
    """Ring-ish directed graph per sample: edges i->(i+1)%N and i->(i+2)%N."""
    src = jnp.arange(N)
    srcs = jnp.concatenate([src, src])
    dsts = jnp.concatenate([(src + 1) % N, (src + 2) % N])
    attrs = jax.random.normal(key, (B, srcs.shape[0]), jnp.float32) * 0.5

    adj = jnp.zeros((B, N, N), jnp.float32).at[:, dsts, srcs].set(1.0)
    ea = jnp.zeros((B, N, N), jnp.float32).at[:, dsts, srcs].set(attrs)

    # add self loops, fill_value='mean' (mean of incoming edge attrs per node)
    deg = jnp.maximum(adj.sum(-1), 1.0)                 # [B, N]
    fill = ea.sum(-1) / deg                             # [B, N]
    idx = jnp.arange(N)
    adj = adj.at[:, idx, idx].set(1.0)
    ea = ea.at[:, idx, idx].set(fill)
    return adj, ea


def init_params(key, num_nodes, out_dim):
    conv1_out = num_nodes // 3
    conv2_out = num_nodes // 2
    ks = jax.random.split(key, 16)
    s = 0.3

    def n(k, shape):
        return jax.random.normal(k, shape, jnp.float32) * s

    # GATConv edge path (edge_dim=1): alpha_edge = e * sum(w_edge * att_edge)
    w_edge1 = n(ks[2], (conv1_out,))
    att_edge1 = n(ks[3], (conv1_out,))
    w_edge2 = n(ks[8], (conv2_out,))
    att_edge2 = n(ks[9], (conv2_out,))

    params = dict(
        w_g1=n(ks[0], (3, conv1_out)),
        att_src1=n(ks[1], (1, conv1_out)),
        att_dst1=n(ks[4], (1, conv1_out)),
        c_edge1=jnp.sum(w_edge1 * att_edge1).reshape(1, 1),
        bias1=n(ks[5], (1, conv1_out)),
        w_g2=n(ks[6], (conv1_out, conv2_out)),
        att_src2=n(ks[7], (1, conv2_out)),
        att_dst2=n(ks[10], (1, conv2_out)),
        c_edge2=jnp.sum(w_edge2 * att_edge2).reshape(1, 1),
        bias2=n(ks[11], (1, conv2_out)),
        w_x1=n(ks[12], (num_nodes * conv2_out, num_nodes)),
        b_x1=n(ks[13], (1, num_nodes)),
        w_x2=n(ks[14], (num_nodes, out_dim)),
        b_x2=n(ks[15], (1, out_dim)),
    )
    return params


if __name__ == "__main__":
    B = 2            # graphs in the batch (loader yields one batched Data)
    num_nodes = 12   # per-graph node count
    out_dim = 5      # GCN(..., out=5)

    key = jax.random.PRNGKey(0)
    k_graph, k_feat, k_param = jax.random.split(key, 3)

    adj, ea = build_batched_graph(k_graph, B, num_nodes)
    x_nodes = jax.random.normal(k_feat, (B, num_nodes, 3), jnp.float32)
    params = init_params(k_param, num_nodes, out_dim)

    # action mask (state[1]); False entries are set to -inf
    mask = jnp.array([[1, 0, 1, 1, 0],
                      [0, 1, 1, 0, 1]], dtype=jnp.bool_)

    y = gcn_forward(x_nodes, adj, ea, params, mask)
    y = jax.block_until_ready(y)
    assert y.shape == (B, out_dim)

    # masked-out entries must be exactly -inf; valid entries must be finite
    assert bool(jnp.all(jnp.where(mask, True, jnp.isneginf(y))))
    assert bool(jnp.all(jnp.where(mask, jnp.isfinite(y), True)))

    # compare against the pure-JAX reference (approx reciprocal in the kernel
    # introduces ~1e-3 relative error in attention weights -> loose tolerance)
    ref = _reference_forward(x_nodes, adj, ea, params, mask)
    err = float(jnp.max(jnp.where(mask, jnp.abs(y - ref), 0.0)))
    assert err < 5e-2, err

    print("KERNEL_OK")
</pallas_src>

<mosaic_0001>
module attributes {stable_mosaic.version = 11 : i64} {
  func.func @_gcn_kernel(%arg0: i32, %arg1: memref<1x2xf32, #tpu.memory_space<smem>>, %arg2: memref<1x12x3xf32, #tpu.memory_space<vmem>>, %arg3: memref<1x12x12xf32, #tpu.memory_space<vmem>>, %arg4: memref<1x12x12xf32, #tpu.memory_space<vmem>>, %arg5: memref<3x4xf32, #tpu.memory_space<vmem>>, %arg6: memref<1x4xf32, #tpu.memory_space<vmem>>, %arg7: memref<1x4xf32, #tpu.memory_space<vmem>>, %arg8: memref<1x4xf32, #tpu.memory_space<vmem>>, %arg9: memref<4x6xf32, #tpu.memory_space<vmem>>, %arg10: memref<1x6xf32, #tpu.memory_space<vmem>>, %arg11: memref<1x6xf32, #tpu.memory_space<vmem>>, %arg12: memref<1x6xf32, #tpu.memory_space<vmem>>, %arg13: memref<72x12xf32, #tpu.memory_space<vmem>>, %arg14: memref<1x12xf32, #tpu.memory_space<vmem>>, %arg15: memref<12x5xf32, #tpu.memory_space<vmem>>, %arg16: memref<1x5xf32, #tpu.memory_space<vmem>>, %arg17: memref<1x1x5xi32, #tpu.memory_space<vmem>>, %arg18: memref<1x1x5xf32, #tpu.memory_space<vmem>>) attributes {dimension_semantics = [#tpu.dimension_semantics<parallel>], iteration_bounds = array<i64: 2>, scalar_prefetch = 0 : i64, scratch_operands = 0 : i64, tpu.core_type = #tpu.core_type<tc>, window_params = [{transform_indices = @transform_0, window_bounds = array<i64: 1, 2>}, {transform_indices = @transform_1, window_bounds = array<i64: 1, 12, 3>}, {transform_indices = @transform_2, window_bounds = array<i64: 1, 12, 12>}, {transform_indices = @transform_3, window_bounds = array<i64: 1, 12, 12>}, {pipeline_mode = #tpu.pipeline_mode<synchronous>, transform_indices = @transform_4, window_bounds = array<i64: 3, 4>}, {pipeline_mode = #tpu.pipeline_mode<synchronous>, transform_indices = @transform_5, window_bounds = array<i64: 1, 4>}, {pipeline_mode = #tpu.pipeline_mode<synchronous>, transform_indices = @transform_6, window_bounds = array<i64: 1, 4>}, {pipeline_mode = #tpu.pipeline_mode<synchronous>, transform_indices = @transform_7, window_bounds = array<i64: 1, 4>}, {pipeline_mode = #tpu.pipeline_mode<synchronous>, transform_indices = @transform_8, window_bounds = array<i64: 4, 6>}, {pipeline_mode = #tpu.pipeline_mode<synchronous>, transform_indices = @transform_9, window_bounds = array<i64: 1, 6>}, {pipeline_mode = #tpu.pipeline_mode<synchronous>, transform_indices = @transform_10, window_bounds = array<i64: 1, 6>}, {pipeline_mode = #tpu.pipeline_mode<synchronous>, transform_indices = @transform_11, window_bounds = array<i64: 1, 6>}, {pipeline_mode = #tpu.pipeline_mode<synchronous>, transform_indices = @transform_12, window_bounds = array<i64: 72, 12>}, {pipeline_mode = #tpu.pipeline_mode<synchronous>, transform_indices = @transform_13, window_bounds = array<i64: 1, 12>}, {pipeline_mode = #tpu.pipeline_mode<synchronous>, transform_indices = @transform_14, window_bounds = array<i64: 12, 5>}, {pipeline_mode = #tpu.pipeline_mode<synchronous>, transform_indices = @transform_15, window_bounds = array<i64: 1, 5>}, {transform_indices = @transform_16, window_bounds = array<i64: 1, 1, 5>}, {transform_indices = @transform_17, window_bounds = array<i64: 1, 1, 5>}]} {
    %c0 = arith.constant 0 : index
    %c0_0 = arith.constant 0 : index
    %c0_1 = arith.constant 0 : index
    %0 = vector.load %arg3[%c0, %c0_0, %c0_1] : memref<1x12x12xf32, #tpu.memory_space<vmem>>, vector<1x12x12xf32>
    %1 = vector.shape_cast %0 : vector<1x12x12xf32> to vector<12x12xf32>
    %cst = arith.constant 0.000000e+00 : f32
    %2 = vector.broadcast %cst : f32 to vector<12x12xf32>
    %3 = arith.cmpf ogt, %1, %2 : vector<12x12xf32>
    %c0_2 = arith.constant 0 : index
    %c0_3 = arith.constant 0 : index
    %c0_4 = arith.constant 0 : index
    %4 = vector.load %arg4[%c0_2, %c0_3, %c0_4] : memref<1x12x12xf32, #tpu.memory_space<vmem>>, vector<1x12x12xf32>
    %5 = vector.shape_cast %4 : vector<1x12x12xf32> to vector<12x12xf32>
    %c0_5 = arith.constant 0 : index
    %c0_6 = arith.constant 0 : index
    %c0_7 = arith.constant 0 : index
    %6 = vector.load %arg2[%c0_5, %c0_6, %c0_7] : memref<1x12x3xf32, #tpu.memory_space<vmem>>, vector<1x12x3xf32>
    %7 = vector.shape_cast %6 : vector<1x12x3xf32> to vector<12x3xf32>
    %c0_8 = arith.constant 0 : index
    %c0_9 = arith.constant 0 : index
    %8 = memref.load %arg1[%c0_8, %c0_9] : memref<1x2xf32, #tpu.memory_space<smem>>
    %9 = vector.broadcast %8 : f32 to vector<12x12xf32>
    %10 = arith.mulf %5, %9 : vector<12x12xf32>
    %c0_10 = arith.constant 0 : index
    %c0_11 = arith.constant 0 : index
    %11 = vector.load %arg5[%c0_10, %c0_11] : memref<3x4xf32, #tpu.memory_space<vmem>>, vector<3x4xf32>
    %c0_12 = arith.constant 0 : index
    %c0_13 = arith.constant 0 : index
    %12 = vector.load %arg6[%c0_12, %c0_13] : memref<1x4xf32, #tpu.memory_space<vmem>>, vector<1x4xf32>
    %c0_14 = arith.constant 0 : index
    %c0_15 = arith.constant 0 : index
    %13 = vector.load %arg7[%c0_14, %c0_15] : memref<1x4xf32, #tpu.memory_space<vmem>>, vector<1x4xf32>
    %c0_16 = arith.constant 0 : index
    %c0_17 = arith.constant 0 : index
    %14 = vector.load %arg8[%c0_16, %c0_17] : memref<1x4xf32, #tpu.memory_space<vmem>>, vector<1x4xf32>
    %cst_18 = arith.constant dense<0.000000e+00> : vector<12x4xf32>
    %15 = tpu.matmul %7, %11, %cst_18 {dimension_numbers = #tpu.dot_dimension_numbers<[1], [0], [0], [1], [0, 0, 1, 1], [], []>} : vector<12x3xf32>, vector<3x4xf32>, vector<12x4xf32> -> vector<12x4xf32>
    %16 = vector.broadcast %13 : vector<1x4xf32> to vector<12x4xf32>
    %17 = arith.mulf %15, %16 : vector<12x4xf32>
    %cst_19 = arith.constant dense<0.000000e+00> : vector<12xf32>
    %18 = vector.multi_reduction <add>, %17, %cst_19 [1] : vector<12x4xf32> to vector<12xf32>
    %19 = vector.shape_cast %18 : vector<12xf32> to vector<12x1xf32>
    %cst_20 = arith.constant dense<0.000000e+00> : vector<1x12xf32>
    %20 = tpu.matmul %12, %15, %cst_20 {dimension_numbers = #tpu.dot_dimension_numbers<[1], [1], [0], [0], [0, 0, 1, 0], [], []>} : vector<1x4xf32>, vector<12x4xf32>, vector<1x12xf32> -> vector<1x12xf32>
    %21 = vector.broadcast %19 : vector<12x1xf32> to vector<12x12xf32>
    %22 = vector.broadcast %20 : vector<1x12xf32> to vector<12x12xf32>
    %23 = arith.addf %21, %22 : vector<12x12xf32>
    %24 = arith.addf %23, %10 : vector<12x12xf32>
    %cst_21 = arith.constant 0.000000e+00 : f32
    %25 = vector.broadcast %cst_21 : f32 to vector<12x12xf32>
    %26 = arith.cmpf ogt, %24, %25 : vector<12x12xf32>
    %cst_22 = arith.constant 2.000000e-01 : f32
    %27 = vector.broadcast %cst_22 : f32 to vector<12x12xf32>
    %28 = arith.mulf %27, %24 : vector<12x12xf32>
    %29 = arith.select %26, %24, %28 : vector<12x12xi1>, vector<12x12xf32>
    %cst_23 = arith.constant -1.000000e+30 : f32
    %30 = vector.broadcast %cst_23 : f32 to vector<12x12xf32>
    %31 = arith.select %3, %29, %30 : vector<12x12xi1>, vector<12x12xf32>
    %cst_24 = arith.constant dense<0xFF800000> : vector<12xf32>
    %32 = vector.multi_reduction <maximumf>, %31, %cst_24 [1] : vector<12x12xf32> to vector<12xf32>
    %33 = vector.shape_cast %32 : vector<12xf32> to vector<12x1xf32>
    %34 = vector.broadcast %33 : vector<12x1xf32> to vector<12x12xf32>
    %35 = arith.subf %31, %34 : vector<12x12xf32>
    %36 = math.exp %35 : vector<12x12xf32>
    %cst_25 = arith.constant 0.000000e+00 : f32
    %37 = vector.broadcast %cst_25 : f32 to vector<12x12xf32>
    %38 = arith.select %3, %36, %37 : vector<12x12xi1>, vector<12x12xf32>
    %cst_26 = arith.constant dense<0.000000e+00> : vector<12xf32>
    %39 = vector.multi_reduction <add>, %38, %cst_26 [1] : vector<12x12xf32> to vector<12xf32>
    %40 = vector.shape_cast %39 : vector<12xf32> to vector<12x1xf32>
    %41 = tpu.reciprocal %40 {approx = true} : vector<12x1xf32> -> vector<12x1xf32>
    %42 = vector.broadcast %41 : vector<12x1xf32> to vector<12x12xf32>
    %43 = arith.mulf %38, %42 : vector<12x12xf32>
    %cst_27 = arith.constant dense<0.000000e+00> : vector<12x4xf32>
    %44 = tpu.matmul %43, %15, %cst_27 {dimension_numbers = #tpu.dot_dimension_numbers<[1], [0], [0], [1], [0, 0, 1, 1], [], []>} : vector<12x12xf32>, vector<12x4xf32>, vector<12x4xf32> -> vector<12x4xf32>
    %45 = vector.broadcast %14 : vector<1x4xf32> to vector<12x4xf32>
    %46 = arith.addf %44, %45 : vector<12x4xf32>
    %cst_28 = arith.constant 0.000000e+00 : f32
    %47 = vector.broadcast %cst_28 : f32 to vector<12x4xf32>
    %48 = arith.cmpf ogt, %46, %47 : vector<12x4xf32>
    %49 = math.exp %46 : vector<12x4xf32>
    %cst_29 = arith.constant 1.000000e+00 : f32
    %50 = vector.broadcast %cst_29 : f32 to vector<12x4xf32>
    %51 = arith.subf %49, %50 : vector<12x4xf32>
    %cst_30 = arith.constant 1.67326319 : f32
    %52 = vector.broadcast %cst_30 : f32 to vector<12x4xf32>
    %53 = arith.mulf %52, %51 : vector<12x4xf32>
    %54 = arith.select %48, %46, %53 : vector<12x4xi1>, vector<12x4xf32>
    %cst_31 = arith.constant 1.05070102 : f32
    %55 = vector.broadcast %cst_31 : f32 to vector<12x4xf32>
    %56 = arith.mulf %55, %54 : vector<12x4xf32>
    %c0_32 = arith.constant 0 : index
    %c1 = arith.constant 1 : index
    %57 = memref.load %arg1[%c0_32, %c1] : memref<1x2xf32, #tpu.memory_space<smem>>
    %58 = vector.broadcast %57 : f32 to vector<12x12xf32>
    %59 = arith.mulf %5, %58 : vector<12x12xf32>
    %c0_33 = arith.constant 0 : index
    %c0_34 = arith.constant 0 : index
    %60 = vector.load %arg9[%c0_33, %c0_34] : memref<4x6xf32, #tpu.memory_space<vmem>>, vector<4x6xf32>
    %c0_35 = arith.constant 0 : index
    %c0_36 = arith.constant 0 : index
    %61 = vector.load %arg10[%c0_35, %c0_36] : memref<1x6xf32, #tpu.memory_space<vmem>>, vector<1x6xf32>
    %c0_37 = arith.constant 0 : index
    %c0_38 = arith.constant 0 : index
    %62 = vector.load %arg11[%c0_37, %c0_38] : memref<1x6xf32, #tpu.memory_space<vmem>>, vector<1x6xf32>
    %c0_39 = arith.constant 0 : index
    %c0_40 = arith.constant 0 : index
    %63 = vector.load %arg12[%c0_39, %c0_40] : memref<1x6xf32, #tpu.memory_space<vmem>>, vector<1x6xf32>
    %cst_41 = arith.constant dense<0.000000e+00> : vector<12x6xf32>
    %64 = tpu.matmul %56, %60, %cst_41 {dimension_numbers = #tpu.dot_dimension_numbers<[1], [0], [0], [1], [0, 0, 1, 1], [], []>} : vector<12x4xf32>, vector<4x6xf32>, vector<12x6xf32> -> vector<12x6xf32>
    %65 = vector.broadcast %62 : vector<1x6xf32> to vector<12x6xf32>
    %66 = arith.mulf %64, %65 : vector<12x6xf32>
    %cst_42 = arith.constant dense<0.000000e+00> : vector<12xf32>
    %67 = vector.multi_reduction <add>, %66, %cst_42 [1] : vector<12x6xf32> to vector<12xf32>
    %68 = vector.shape_cast %67 : vector<12xf32> to vector<12x1xf32>
    %cst_43 = arith.constant dense<0.000000e+00> : vector<1x12xf32>
    %69 = tpu.matmul %61, %64, %cst_43 {dimension_numbers = #tpu.dot_dimension_numbers<[1], [1], [0], [0], [0, 0, 1, 0], [], []>} : vector<1x6xf32>, vector<12x6xf32>, vector<1x12xf32> -> vector<1x12xf32>
    %70 = vector.broadcast %68 : vector<12x1xf32> to vector<12x12xf32>
    %71 = vector.broadcast %69 : vector<1x12xf32> to vector<12x12xf32>
    %72 = arith.addf %70, %71 : vector<12x12xf32>
    %73 = arith.addf %72, %59 : vector<12x12xf32>
    %cst_44 = arith.constant 0.000000e+00 : f32
    %74 = vector.broadcast %cst_44 : f32 to vector<12x12xf32>
    %75 = arith.cmpf ogt, %73, %74 : vector<12x12xf32>
    %cst_45 = arith.constant 2.000000e-01 : f32
    %76 = vector.broadcast %cst_45 : f32 to vector<12x12xf32>
    %77 = arith.mulf %76, %73 : vector<12x12xf32>
    %78 = arith.select %75, %73, %77 : vector<12x12xi1>, vector<12x12xf32>
    %cst_46 = arith.constant -1.000000e+30 : f32
    %79 = vector.broadcast %cst_46 : f32 to vector<12x12xf32>
    %80 = arith.select %3, %78, %79 : vector<12x12xi1>, vector<12x12xf32>
    %cst_47 = arith.constant dense<0xFF800000> : vector<12xf32>
    %81 = vector.multi_reduction <maximumf>, %80, %cst_47 [1] : vector<12x12xf32> to vector<12xf32>
    %82 = vector.shape_cast %81 : vector<12xf32> to vector<12x1xf32>
    %83 = vector.broadcast %82 : vector<12x1xf32> to vector<12x12xf32>
    %84 = arith.subf %80, %83 : vector<12x12xf32>
    %85 = math.exp %84 : vector<12x12xf32>
    %cst_48 = arith.constant 0.000000e+00 : f32
    %86 = vector.broadcast %cst_48 : f32 to vector<12x12xf32>
    %87 = arith.select %3, %85, %86 : vector<12x12xi1>, vector<12x12xf32>
    %cst_49 = arith.constant dense<0.000000e+00> : vector<12xf32>
    %88 = vector.multi_reduction <add>, %87, %cst_49 [1] : vector<12x12xf32> to vector<12xf32>
    %89 = vector.shape_cast %88 : vector<12xf32> to vector<12x1xf32>
    %90 = tpu.reciprocal %89 {approx = true} : vector<12x1xf32> -> vector<12x1xf32>
    %91 = vector.broadcast %90 : vector<12x1xf32> to vector<12x12xf32>
    %92 = arith.mulf %87, %91 : vector<12x12xf32>
    %cst_50 = arith.constant dense<0.000000e+00> : vector<12x6xf32>
    %93 = tpu.matmul %92, %64, %cst_50 {dimension_numbers = #tpu.dot_dimension_numbers<[1], [0], [0], [1], [0, 0, 1, 1], [], []>} : vector<12x12xf32>, vector<12x6xf32>, vector<12x6xf32> -> vector<12x6xf32>
    %94 = vector.broadcast %63 : vector<1x6xf32> to vector<12x6xf32>
    %95 = arith.addf %93, %94 : vector<12x6xf32>
    %cst_51 = arith.constant 0.000000e+00 : f32
    %96 = vector.broadcast %cst_51 : f32 to vector<12x6xf32>
    %97 = arith.cmpf ogt, %95, %96 : vector<12x6xf32>
    %98 = math.exp %95 : vector<12x6xf32>
    %cst_52 = arith.constant 1.000000e+00 : f32
    %99 = vector.broadcast %cst_52 : f32 to vector<12x6xf32>
    %100 = arith.subf %98, %99 : vector<12x6xf32>
    %cst_53 = arith.constant 1.67326319 : f32
    %101 = vector.broadcast %cst_53 : f32 to vector<12x6xf32>
    %102 = arith.mulf %101, %100 : vector<12x6xf32>
    %103 = arith.select %97, %95, %102 : vector<12x6xi1>, vector<12x6xf32>
    %cst_54 = arith.constant 1.05070102 : f32
    %104 = vector.broadcast %cst_54 : f32 to vector<12x6xf32>
    %105 = arith.mulf %104, %103 : vector<12x6xf32>
    %c0_55 = arith.constant 0 : index
    %c0_56 = arith.constant 0 : index
    %106 = vector.load %arg13[%c0_55, %c0_56] : memref<72x12xf32, #tpu.memory_space<vmem>>, vector<72x12xf32>
    %c0_57 = arith.constant 0 : index
    %c0_58 = arith.constant 0 : index
    %107 = vector.load %arg14[%c0_57, %c0_58] : memref<1x12xf32, #tpu.memory_space<vmem>>, vector<1x12xf32>
    %108 = vector.extract_strided_slice %105 {offsets = [0, 0], sizes = [1, 6], strides = [1, 1]} : vector<12x6xf32> to vector<1x6xf32>
    %109 = vector.extract_strided_slice %106 {offsets = [0, 0], sizes = [6, 12], strides = [1, 1]} : vector<72x12xf32> to vector<6x12xf32>
    %cst_59 = arith.constant dense<0.000000e+00> : vector<1x12xf32>
    %110 = tpu.matmul %108, %109, %cst_59 {dimension_numbers = #tpu.dot_dimension_numbers<[1], [0], [0], [1], [0, 0, 1, 1], [], []>} : vector<1x6xf32>, vector<6x12xf32>, vector<1x12xf32> -> vector<1x12xf32>
    %111 = arith.addf %107, %110 : vector<1x12xf32>
    %112 = vector.extract_strided_slice %105 {offsets = [1, 0], sizes = [1, 6], strides = [1, 1]} : vector<12x6xf32> to vector<1x6xf32>
    %113 = vector.extract_strided_slice %106 {offsets = [6, 0], sizes = [6, 12], strides = [1, 1]} : vector<72x12xf32> to vector<6x12xf32>
    %cst_60 = arith.constant dense<0.000000e+00> : vector<1x12xf32>
    %114 = tpu.matmul %112, %113, %cst_60 {dimension_numbers = #tpu.dot_dimension_numbers<[1], [0], [0], [1], [0, 0, 1, 1], [], []>} : vector<1x6xf32>, vector<6x12xf32>, vector<1x12xf32> -> vector<1x12xf32>
    %115 = arith.addf %111, %114 : vector<1x12xf32>
    %116 = vector.extract_strided_slice %105 {offsets = [2, 0], sizes = [1, 6], strides = [1, 1]} : vector<12x6xf32> to vector<1x6xf32>
    %117 = vector.extract_strided_slice %106 {offsets = [12, 0], sizes = [6, 12], strides = [1, 1]} : vector<72x12xf32> to vector<6x12xf32>
    %cst_61 = arith.constant dense<0.000000e+00> : vector<1x12xf32>
    %118 = tpu.matmul %116, %117, %cst_61 {dimension_numbers = #tpu.dot_dimension_numbers<[1], [0], [0], [1], [0, 0, 1, 1], [], []>} : vector<1x6xf32>, vector<6x12xf32>, vector<1x12xf32> -> vector<1x12xf32>
    %119 = arith.addf %115, %118 : vector<1x12xf32>
    %120 = vector.extract_strided_slice %105 {offsets = [3, 0], sizes = [1, 6], strides = [1, 1]} : vector<12x6xf32> to vector<1x6xf32>
    %121 = vector.extract_strided_slice %106 {offsets = [18, 0], sizes = [6, 12], strides = [1, 1]} : vector<72x12xf32> to vector<6x12xf32>
    %cst_62 = arith.constant dense<0.000000e+00> : vector<1x12xf32>
    %122 = tpu.matmul %120, %121, %cst_62 {dimension_numbers = #tpu.dot_dimension_numbers<[1], [0], [0], [1], [0, 0, 1, 1], [], []>} : vector<1x6xf32>, vector<6x12xf32>, vector<1x12xf32> -> vector<1x12xf32>
    %123 = arith.addf %119, %122 : vector<1x12xf32>
    %124 = vector.extract_strided_slice %105 {offsets = [4, 0], sizes = [1, 6], strides = [1, 1]} : vector<12x6xf32> to vector<1x6xf32>
    %125 = vector.extract_strided_slice %106 {offsets = [24, 0], sizes = [6, 12], strides = [1, 1]} : vector<72x12xf32> to vector<6x12xf32>
    %cst_63 = arith.constant dense<0.000000e+00> : vector<1x12xf32>
    %126 = tpu.matmul %124, %125, %cst_63 {dimension_numbers = #tpu.dot_dimension_numbers<[1], [0], [0], [1], [0, 0, 1, 1], [], []>} : vector<1x6xf32>, vector<6x12xf32>, vector<1x12xf32> -> vector<1x12xf32>
    %127 = arith.addf %123, %126 : vector<1x12xf32>
    %128 = vector.extract_strided_slice %105 {offsets = [5, 0], sizes = [1, 6], strides = [1, 1]} : vector<12x6xf32> to vector<1x6xf32>
    %129 = vector.extract_strided_slice %106 {offsets = [30, 0], sizes = [6, 12], strides = [1, 1]} : vector<72x12xf32> to vector<6x12xf32>
    %cst_64 = arith.constant dense<0.000000e+00> : vector<1x12xf32>
    %130 = tpu.matmul %128, %129, %cst_64 {dimension_numbers = #tpu.dot_dimension_numbers<[1], [0], [0], [1], [0, 0, 1, 1], [], []>} : vector<1x6xf32>, vector<6x12xf32>, vector<1x12xf32> -> vector<1x12xf32>
    %131 = arith.addf %127, %130 : vector<1x12xf32>
    %132 = vector.extract_strided_slice %105 {offsets = [6, 0], sizes = [1, 6], strides = [1, 1]} : vector<12x6xf32> to vector<1x6xf32>
    %133 = vector.extract_strided_slice %106 {offsets = [36, 0], sizes = [6, 12], strides = [1, 1]} : vector<72x12xf32> to vector<6x12xf32>
    %cst_65 = arith.constant dense<0.000000e+00> : vector<1x12xf32>
    %134 = tpu.matmul %132, %133, %cst_65 {dimension_numbers = #tpu.dot_dimension_numbers<[1], [0], [0], [1], [0, 0, 1, 1], [], []>} : vector<1x6xf32>, vector<6x12xf32>, vector<1x12xf32> -> vector<1x12xf32>
    %135 = arith.addf %131, %134 : vector<1x12xf32>
    %136 = vector.extract_strided_slice %105 {offsets = [7, 0], sizes = [1, 6], strides = [1, 1]} : vector<12x6xf32> to vector<1x6xf32>
    %137 = vector.extract_strided_slice %106 {offsets = [42, 0], sizes = [6, 12], strides = [1, 1]} : vector<72x12xf32> to vector<6x12xf32>
    %cst_66 = arith.constant dense<0.000000e+00> : vector<1x12xf32>
    %138 = tpu.matmul %136, %137, %cst_66 {dimension_numbers = #tpu.dot_dimension_numbers<[1], [0], [0], [1], [0, 0, 1, 1], [], []>} : vector<1x6xf32>, vector<6x12xf32>, vector<1x12xf32> -> vector<1x12xf32>
    %139 = arith.addf %135, %138 : vector<1x12xf32>
    %140 = vector.extract_strided_slice %105 {offsets = [8, 0], sizes = [1, 6], strides = [1, 1]} : vector<12x6xf32> to vector<1x6xf32>
    %141 = vector.extract_strided_slice %106 {offsets = [48, 0], sizes = [6, 12], strides = [1, 1]} : vector<72x12xf32> to vector<6x12xf32>
    %cst_67 = arith.constant dense<0.000000e+00> : vector<1x12xf32>
    %142 = tpu.matmul %140, %141, %cst_67 {dimension_numbers = #tpu.dot_dimension_numbers<[1], [0], [0], [1], [0, 0, 1, 1], [], []>} : vector<1x6xf32>, vector<6x12xf32>, vector<1x12xf32> -> vector<1x12xf32>
    %143 = arith.addf %139, %142 : vector<1x12xf32>
    %144 = vector.extract_strided_slice %105 {offsets = [9, 0], sizes = [1, 6], strides = [1, 1]} : vector<12x6xf32> to vector<1x6xf32>
    %145 = vector.extract_strided_slice %106 {offsets = [54, 0], sizes = [6, 12], strides = [1, 1]} : vector<72x12xf32> to vector<6x12xf32>
    %cst_68 = arith.constant dense<0.000000e+00> : vector<1x12xf32>
    %146 = tpu.matmul %144, %145, %cst_68 {dimension_numbers = #tpu.dot_dimension_numbers<[1], [0], [0], [1], [0, 0, 1, 1], [], []>} : vector<1x6xf32>, vector<6x12xf32>, vector<1x12xf32> -> vector<1x12xf32>
    %147 = arith.addf %143, %146 : vector<1x12xf32>
    %148 = vector.extract_strided_slice %105 {offsets = [10, 0], sizes = [1, 6], strides = [1, 1]} : vector<12x6xf32> to vector<1x6xf32>
    %149 = vector.extract_strided_slice %106 {offsets = [60, 0], sizes = [6, 12], strides = [1, 1]} : vector<72x12xf32> to vector<6x12xf32>
    %cst_69 = arith.constant dense<0.000000e+00> : vector<1x12xf32>
    %150 = tpu.matmul %148, %149, %cst_69 {dimension_numbers = #tpu.dot_dimension_numbers<[1], [0], [0], [1], [0, 0, 1, 1], [], []>} : vector<1x6xf32>, vector<6x12xf32>, vector<1x12xf32> -> vector<1x12xf32>
    %151 = arith.addf %147, %150 : vector<1x12xf32>
    %152 = vector.extract_strided_slice %105 {offsets = [11, 0], sizes = [1, 6], strides = [1, 1]} : vector<12x6xf32> to vector<1x6xf32>
    %153 = vector.extract_strided_slice %106 {offsets = [66, 0], sizes = [6, 12], strides = [1, 1]} : vector<72x12xf32> to vector<6x12xf32>
    %cst_70 = arith.constant dense<0.000000e+00> : vector<1x12xf32>
    %154 = tpu.matmul %152, %153, %cst_70 {dimension_numbers = #tpu.dot_dimension_numbers<[1], [0], [0], [1], [0, 0, 1, 1], [], []>} : vector<1x6xf32>, vector<6x12xf32>, vector<1x12xf32> -> vector<1x12xf32>
    %155 = arith.addf %151, %154 : vector<1x12xf32>
    %cst_71 = arith.constant 0.000000e+00 : f32
    %156 = vector.broadcast %cst_71 : f32 to vector<1x12xf32>
    %157 = arith.cmpf ogt, %155, %156 : vector<1x12xf32>
    %158 = math.exp %155 : vector<1x12xf32>
    %cst_72 = arith.constant 1.000000e+00 : f32
    %159 = vector.broadcast %cst_72 : f32 to vector<1x12xf32>
    %160 = arith.subf %158, %159 : vector<1x12xf32>
    %cst_73 = arith.constant 1.67326319 : f32
    %161 = vector.broadcast %cst_73 : f32 to vector<1x12xf32>
    %162 = arith.mulf %161, %160 : vector<1x12xf32>
    %163 = arith.select %157, %155, %162 : vector<1x12xi1>, vector<1x12xf32>
    %cst_74 = arith.constant 1.05070102 : f32
    %164 = vector.broadcast %cst_74 : f32 to vector<1x12xf32>
    %165 = arith.mulf %164, %163 : vector<1x12xf32>
    %c0_75 = arith.constant 0 : index
    %c0_76 = arith.constant 0 : index
    %166 = vector.load %arg15[%c0_75, %c0_76] : memref<12x5xf32, #tpu.memory_space<vmem>>, vector<12x5xf32>
    %cst_77 = arith.constant dense<0.000000e+00> : vector<1x5xf32>
    %167 = tpu.matmul %165, %166, %cst_77 {dimension_numbers = #tpu.dot_dimension_numbers<[1], [0], [0], [1], [0, 0, 1, 1], [], []>} : vector<1x12xf32>, vector<12x5xf32>, vector<1x5xf32> -> vector<1x5xf32>
    %c0_78 = arith.constant 0 : index
    %c0_79 = arith.constant 0 : index
    %168 = vector.load %arg16[%c0_78, %c0_79] : memref<1x5xf32, #tpu.memory_space<vmem>>, vector<1x5xf32>
    %169 = arith.addf %167, %168 : vector<1x5xf32>
    %c0_80 = arith.constant 0 : index
    %c0_81 = arith.constant 0 : index
    %c0_82 = arith.constant 0 : index
    %170 = vector.load %arg17[%c0_80, %c0_81, %c0_82] : memref<1x1x5xi32, #tpu.memory_space<vmem>>, vector<1x1x5xi32>
    %171 = vector.shape_cast %170 : vector<1x1x5xi32> to vector<1x5xi32>
    %c0_i32 = arith.constant 0 : i32
    %172 = vector.broadcast %c0_i32 : i32 to vector<1x5xi32>
    %173 = arith.cmpi sgt, %171, %172 : vector<1x5xi32>
    %cst_83 = arith.constant 0xFF800000 : f32
    %174 = vector.broadcast %cst_83 : f32 to vector<1x5xf32>
    %175 = arith.select %173, %169, %174 : vector<1x5xi1>, vector<1x5xf32>
    %c0_84 = arith.constant 0 : index
    %c0_85 = arith.constant 0 : index
    %c0_86 = arith.constant 0 : index
    %176 = vector.load %arg18[%c0_84, %c0_85, %c0_86] : memref<1x1x5xf32, #tpu.memory_space<vmem>>, vector<1x1x5xf32>
    %177 = vector.shape_cast %176 : vector<1x1x5xf32> to vector<1x5xf32>
    %178 = vector.shape_cast %175 : vector<1x5xf32> to vector<1x1x5xf32>
    tpu.vector_store %arg18[%c0_84, %c0_85, %c0_86], %178 {strides = array<i32>} : memref<1x1x5xf32, #tpu.memory_space<vmem>>, vector<1x1x5xf32>,
    return
  }
  func.func @transform_0(%arg0: i32) -> (i32, i32) {
    %c0_i32 = arith.constant 0 : i32
    %c0_i32_0 = arith.constant 0 : i32
    %c0_i32_1 = arith.constant 0 : i32
    return %c0_i32, %c0_i32_0 : i32, i32
  }
  func.func @transform_1(%arg0: i32) -> (i32, i32, i32) {
    %c0_i32 = arith.constant 0 : i32
    %c0_i32_0 = arith.constant 0 : i32
    %c0_i32_1 = arith.constant 0 : i32
    return %arg0, %c0_i32, %c0_i32_0 : i32, i32, i32
  }
  func.func @transform_2(%arg0: i32) -> (i32, i32, i32) {
    %c0_i32 = arith.constant 0 : i32
    %c0_i32_0 = arith.constant 0 : i32
    %c0_i32_1 = arith.constant 0 : i32
    return %arg0, %c0_i32, %c0_i32_0 : i32, i32, i32
  }
  func.func @transform_3(%arg0: i32) -> (i32, i32, i32) {
    %c0_i32 = arith.constant 0 : i32
    %c0_i32_0 = arith.constant 0 : i32
    %c0_i32_1 = arith.constant 0 : i32
    return %arg0, %c0_i32, %c0_i32_0 : i32, i32, i32
  }
  func.func @transform_4(%arg0: i32) -> (i32, i32) {
    %c0_i32 = arith.constant 0 : i32
    %c0_i32_0 = arith.constant 0 : i32
    %c0_i32_1 = arith.constant 0 : i32
    return %c0_i32, %c0_i32_0 : i32, i32
  }
  func.func @transform_5(%arg0: i32) -> (i32, i32) {
    %c0_i32 = arith.constant 0 : i32
    %c0_i32_0 = arith.constant 0 : i32
    %c0_i32_1 = arith.constant 0 : i32
    return %c0_i32, %c0_i32_0 : i32, i32
  }
  func.func @transform_6(%arg0: i32) -> (i32, i32) {
    %c0_i32 = arith.constant 0 : i32
    %c0_i32_0 = arith.constant 0 : i32
    %c0_i32_1 = arith.constant 0 : i32
    return %c0_i32, %c0_i32_0 : i32, i32
  }
  func.func @transform_7(%arg0: i32) -> (i32, i32) {
    %c0_i32 = arith.constant 0 : i32
    %c0_i32_0 = arith.constant 0 : i32
    %c0_i32_1 = arith.constant 0 : i32
    return %c0_i32, %c0_i32_0 : i32, i32
  }
  func.func @transform_8(%arg0: i32) -> (i32, i32) {
    %c0_i32 = arith.constant 0 : i32
    %c0_i32_0 = arith.constant 0 : i32
    %c0_i32_1 = arith.constant 0 : i32
    return %c0_i32, %c0_i32_0 : i32, i32
  }
  func.func @transform_9(%arg0: i32) -> (i32, i32) {
    %c0_i32 = arith.constant 0 : i32
    %c0_i32_0 = arith.constant 0 : i32
    %c0_i32_1 = arith.constant 0 : i32
    return %c0_i32, %c0_i32_0 : i32, i32
  }
  func.func @transform_10(%arg0: i32) -> (i32, i32) {
    %c0_i32 = arith.constant 0 : i32
    %c0_i32_0 = arith.constant 0 : i32
    %c0_i32_1 = arith.constant 0 : i32
    return %c0_i32, %c0_i32_0 : i32, i32
  }
  func.func @transform_11(%arg0: i32) -> (i32, i32) {
    %c0_i32 = arith.constant 0 : i32
    %c0_i32_0 = arith.constant 0 : i32
    %c0_i32_1 = arith.constant 0 : i32
    return %c0_i32, %c0_i32_0 : i32, i32
  }
  func.func @transform_12(%arg0: i32) -> (i32, i32) {
    %c0_i32 = arith.constant 0 : i32
    %c0_i32_0 = arith.constant 0 : i32
    %c0_i32_1 = arith.constant 0 : i32
    return %c0_i32, %c0_i32_0 : i32, i32
  }
  func.func @transform_13(%arg0: i32) -> (i32, i32) {
    %c0_i32 = arith.constant 0 : i32
    %c0_i32_0 = arith.constant 0 : i32
    %c0_i32_1 = arith.constant 0 : i32
    return %c0_i32, %c0_i32_0 : i32, i32
  }
  func.func @transform_14(%arg0: i32) -> (i32, i32) {
    %c0_i32 = arith.constant 0 : i32
    %c0_i32_0 = arith.constant 0 : i32
    %c0_i32_1 = arith.constant 0 : i32
    return %c0_i32, %c0_i32_0 : i32, i32
  }
  func.func @transform_15(%arg0: i32) -> (i32, i32) {
    %c0_i32 = arith.constant 0 : i32
    %c0_i32_0 = arith.constant 0 : i32
    %c0_i32_1 = arith.constant 0 : i32
    return %c0_i32, %c0_i32_0 : i32, i32
  }
  func.func @transform_16(%arg0: i32) -> (i32, i32, i32) {
    %c0_i32 = arith.constant 0 : i32
    %c0_i32_0 = arith.constant 0 : i32
    %c0_i32_1 = arith.constant 0 : i32
    return %arg0, %c0_i32, %c0_i32_0 : i32, i32, i32
  }
  func.func @transform_17(%arg0: i32) -> (i32, i32, i32) {
    %c0_i32 = arith.constant 0 : i32
    %c0_i32_0 = arith.constant 0 : i32
    %c0_i32_1 = arith.constant 0 : i32
    return %arg0, %c0_i32, %c0_i32_0 : i32, i32, i32
  }
}

</mosaic_0001>

<bundles_post_ra>
// kernel: tpu_custom_call.1
= control target key start
LH: loop header
LB: loop body
LE: loop exit
PB: predicated region body
PF: predicated region fallthrough
CT: control target
= control target key end

     0   :  { %s3325_s0 = inlined_call_operand.vmem [shape: f32[1,2], index: 0, kind: input, shape index: {}]   ;;  %s3326_s1 = inlined_call_operand.vmem [shape: f32[2,12,3], index: 1, kind: input, shape index: {}]   ;;  %s3327_s2 = inlined_call_operand.vmem [shape: f32[2,12,12], index: 2, kind: input, shape index: {}]   ;;  %s3328_s3 = inlined_call_operand.vmem [shape: f32[2,12,12], index: 3, kind: input, shape index: {}]   ;;  %s3329_s4 = inlined_call_operand.vmem [shape: f32[3,4], index: 4, kind: input, shape index: {}]   ;;  %s3330_s5 = inlined_call_operand.vmem [shape: f32[1,4], index: 5, kind: input, shape index: {}]   ;;  %s3331_s6 = inlined_call_operand.vmem [shape: f32[1,4], index: 6, kind: input, shape index: {}]   ;;  %s3332_s7 = inlined_call_operand.vmem [shape: f32[1,4], index: 7, kind: input, shape index: {}]   ;;  %s3333_s8 = inlined_call_operand.vmem [shape: f32[4,6], index: 8, kind: input, shape index: {}]   ;;  %s3334_s9 = inlined_call_operand.vmem [shape: f32[1,6], index: 9, kind: input, shape index: {}]   ;;  %s3335_s10 = inlined_call_operand.vmem [shape: f32[1,6], index: 10, kind: input, shape index: {}]   ;;  %s3336_s11 = inlined_call_operand.vmem [shape: f32[1,6], index: 11, kind: input, shape index: {}]   ;;  %s3337_s12 = inlined_call_operand.vmem [shape: f32[72,12], index: 12, kind: input, shape index: {}]   ;;  %s3338_s13 = inlined_call_operand.vmem [shape: f32[1,12], index: 13, kind: input, shape index: {}]   ;;  %s3339_s14 = inlined_call_operand.vmem [shape: f32[12,5], index: 14, kind: input, shape index: {}]   ;;  %s3340_s15 = inlined_call_operand.vmem [shape: f32[1,5], index: 15, kind: input, shape index: {}]   ;;  %s3341_s16 = inlined_call_operand.vmem [shape: s32[2,1,5], index: 16, kind: input, shape index: {}]   ;;  %s3342_s17 = inlined_call_operand.hbm [shape: f32[2,1,5], index: 17, kind: output, shape index: {}]  }
   0x1   :  { %3344 = sst [smem:[#allocation10_spill]] %s3325_s0 }
   0x2   :  { %3345 = sst [smem:[#allocation11_spill]] %s3326_s1 }
   0x3   :  { %3346 = sst [smem:[#allocation12_spill]] %s3327_s2 }
   0x4   :  { %3347 = sst [smem:[#allocation13_spill]] %s3328_s3 }
   0x5   :  { %3348 = sst [smem:[#allocation14_spill]] %s3329_s4 }
   0x6   :  { %3349 = sst [smem:[#allocation15_spill]] %s3330_s5 }
   0x7   :  { %3350 = sst [smem:[#allocation16_spill]] %s3331_s6 }
   0x8   :  { %22 = vsyncpa [#allocation4], 0 }
   0x9   :  { %23 = vsyncpa [#allocation3], 0 }
   0xa   :  { %25 = vsyncpa [#allocation3 + $0x1], 0  ;;  %s2974_s24 = smov 0   ;;  %s2976_s25 = smov 0  }
   0xb   :  { %s2978_s26 = smov 0   ;;  %s2980_s27 = smov 0  }
   0xc LB: > { %3351 = sst [smem:[#allocation8_spill]] %s2872_s26  ;;  %s2995_s28 = sadd.s32 4294967295, %s2876_s27   ;;  %s2876_s27 = sphi %s2980_s27, %s3369_s27   ;;  %s2872_s26 = sphi %s2978_s26, %s3366_s26   ;;  %s2868_s25 = sphi %s2976_s25, %s3368_s25   ;;  %s2864_s24 = sphi %s2974_s24, %s3367_s24  }
   0xd   : > { %s2445_s29 = sadd.s32 4294967294, %s2876_s27   ;;  %s2999_s0 = sadd.s32 1, %s2876_s27  }
   0xe   : > { %s415_s30 = sadd.s32 1, %s2872_s26  ;;  %s412_s18 = ssub.s32 %s2876_s27, %s2999_s0 }
   0xf   : > { %p425_p0 = scmp.ne.s32.totalorder %s2872_s26, %s2868_s25  ;;  %p413_p1 = scmp.eq.s32.totalorder %s412_s18, 0 }
  0x10   : > { %p426_p2 = scmp.eq.s32.totalorder %s2995_s28, 1  ;;  %p431_p3 = scmp.ne.s32.totalorder %s2868_s25, %s2864_s24 }
  0x11   : > { %p432_p4 = scmp.eq.s32.totalorder %s2445_s29, 1  ;;  %p2446_p7 = scmp.ge.s32.totalorder %s2876_s27, 1 }
  0x12   : > { %s3010_s19 = scalar_select %p413_p1, %s2872_s26, %s415_s30  }
  0x13   : > { %p3012_p5 = por %p426_p2, %p425_p0  ;;  %p3016_p6 = por %p432_p4, %p431_p3 }
  0x14   : > { %3352 = sst [smem:[#allocation9_spill]] %s3010_s19  ;;  %p439_p8 = scmp.lt.s32.totalorder %s2876_s27, 3 }
  0x15   : > { %p2729_p9 = scmp.eq.s32.totalorder %s2995_s28, 0  ;;  %s3356_s29 = sld [smem:[#allocation10_spill]] }
  0x16   : > { %p3023_p10 = pnand %p2446_p7, %p439_p8 }
  0x18   : > { %p2721_p11 = pneg %p3023_p10 }
  0x1a   : > { %p2722_p12 = pnand %p2729_p9, %p2721_p11 }
  0x1b   : > { %s452_s30 = sshll.u32 %s3356_s29, 4  ;;  %s453_s30 = int_to_ptr.vmem [resolvable:$true] %s452_s30 }
  0x1c   : > { %s2795_s18 = scalar_lea.vmem %s453_s30, 16  ;;  %p2797_p0 = pneg %p2722_p12 }
  0x1d   : > { %p2796_p13 = scmp.ne.s32.totalorder %s453_s30, %s2795_s18  ;;  %p2803_p3 = scmp.lt.s32.totalorder %s453_s30, %s453_s30 }
  0x1e   : > { %p2804_p4 = scmp.lt.s32.totalorder %s2795_s18, %s2795_s18 }
  0x1f   : > { %p2798_p1 = pnand %p2797_p0, %p2796_p13 }
  0x20   : > { %p2805_p7 = por %p2804_p4, %p2803_p3 }
  0x21   : > { %p2799_p2 = pneg %p2798_p1 }
  0x23   : > { %p2806_p8 = pnand %p2805_p7, %p2799_p2 }
  0x25   : > { %2809 = shalt.err (!%p2806_p8)
}
  0x26   : > { %s2878_s19 = smov [#allocation2]   ;;  %531 = sbr.rel (%p3023_p10) target bundleno = 2598 (0xa26), region = 88 }
  0x27   : > { %2724 = dma.vmem_to_smem (!%p2722_p12), %s453_s30, 16, %s2878_s19, [#allocation4]  }
  0x2d   : > { %2855 = dma.done.wait (%p2729_p9), [#allocation4], 16  }
  0x2e   : > { %2857 = vsyncadd (%p2729_p9), [#allocation4], 4294967280 }
  0x2f   : > { %537 = sfence }
  0x30   : > { %s3357_s4 = sld [smem:[#allocation14_spill]]  ;;  %vm637_vm0 = vcmask 1042432   ;;  %p596_p11 = scmp.lt.s32.totalorder %s2995_s28, 1  ;;  %vm630_vm1 = vcmask 23552   ;;  %v2879_v3 = vmov 0.0|0.0   ;;  %vm2880_vm2 = vmmov 0  }
  0x31   : > { %s3358_s18 = sld [smem:[#allocation11_spill]]  ;;  %v2881_v4 = vmov 0.0   ;;  %vm724_vm3 = vcmask 31744   ;;  %s3359_s6 = sld [smem:[#allocation16_spill]]  ;;  %vm865_vm4 = vcmask 1043456   ;;  %vm2882_vm6 = vmmov 1  }
  0x32   : > { %s3045_s19 = scalar_select %p596_p11, %s2995_s28, 1  ;;  %2607 = vmatprep.subr.mxu0 %v2881_v4  ;;  %2609 = vmatprep.mubr.msk.f32.mxu0 %vm2880_vm2, %v2881_v4  ;;  %vm2671_vm5 = vmpackc.low %vm724_vm3, %vm724_vm3  ;;  %vm728_vm8 = vcmask 27648   ;;  %v811_v15 = vlaneseq  ;;  %vm827_vm12 = vcmask 97280   ;;  %vm831_vm14 = vcmask 93184   ;;  %v961_v60 = vld [vmem:[%s3333_s8] sm:$0xf] }
  0x33   : > { %vm3066_vm7 = vmpackc.low %vm865_vm4, %vm2882_vm6  ;;  %s3362_s5 = sld [smem:[#allocation15_spill]]  ;;  %s622_s30 = sld [smem:[#allocation2]]  ;;  %v2464_v61 = vld [vmem:[%s3332_s7] ss:$0 sm:$0xff] }
  0x34   : > { %s3048_s21 = sshll.u32 %s3045_s19, 4  ;;  %v3079_v16 = vshrl.u32 %v811_v15, 7  ;;  %s3363_s3 = sld [smem:[#allocation13_spill]] }
  0x35   : > { %s3364_s2 = sld [smem:[#allocation12_spill]]  ;;  %s2883_s22 = smov [#allocation5]  }
  0x36   : > { %v626_v0 = vld [vmem:[%s3357_s4] sm:$0x7]  ;;  %v813_v18 = vsub.s32 0, %v3079_v16 }
  0x37   : > { %2564 = vmatprep.subr.msk.mxu1 %vm637_vm0, %v626_v0  ;;  %s600_s26 = scalar_lea.vmem %s3358_s18, %s3048_s21  ;;  %v2460_v5 = vld [vmem:[%s3359_s6] ss:$0 sm:$0xff]  ;;  %s594_s18 = sand.u32 1, %s2868_s25  }
  0x38   : > { %2565 = vmatpush3.msk.msra.mxu1 %vm637_vm0, %v626_v0  ;;  %v620_v1 = vld [vmem:[%s600_s26] sm:$0xff]  ;;  %v621_v2 = vld [vmem:[%s600_s26 + $0x8] sm:$0xf]  ;;  %s613_s26 = scalar_lea.vmem %s3341_s16, %s3045_s19 }
  0x39   : > { %2566 = vmatprep.mubr.msk.f32.mxu1 %vm630_vm1, %v620_v1  ;;  %2669 = vmatprep.subr.bf16.mxu1 %v2879_v3  ;;  %v627_v14 = vld [vmem:[%s3362_s5] sm:$0x1]  ;;  %v623_v21 = vstv %s622_s30  ;;  %s595_s30 = scalar_lea.vmem [#allocation5], %s594_s18 }
  0x3a   : > { %2567 = vmatmul.mubr.msk.f32.vlgmr.msra.gmra.mrb[0].mxu1 %vm630_vm1, %v621_v2  ;;  %s610_s23 = scalar_lea.vmem %s3363_s3, %s3048_s21  ;;  %vm1057_vm1 = vcmask 48128  }
  0x3b   : > { %2573 = vmatprep.mubr.msk.f32.mxu1 %vm2880_vm2, %v2881_v4  ;;  %v3086_v19 = vld [vmem:[%s610_s23] sm:$0xff]  ;;  %v3088_v20 = vld [vmem:[%s610_s23 + $0x8] sm:$0xf]  ;;  %s605_s4 = scalar_lea.vmem %s3364_s2, %s3048_s21  ;;  %vm2681_vm6 = vmpackc.low %vm1057_vm1, %vm1057_vm1  ;;  %s2511_s21 = sshll.u32 %s2995_s28, 4 }
  0x3c   : > { %v624_v23 = vmul.f32 %v623_v21, %v3086_v19  ;;  %v625_v24 = vmul.f32 %v623_v21, %v3088_v20  ;;  %v3098_v30 = vld [vmem:[%s605_s4] sm:$0xff]  ;;  %v3101_v33 = vld [vmem:[%s605_s4 + $0x8] sm:$0xf]  ;;  %s2470_s4 = sld [smem:[#allocation2 + $0x1]]  ;;  %s2345_s2 = sshll.u32 %s595_s30, 4  ;;  %s3285_s2 = int_to_ptr.vmem [resolvable:$true] %s2345_s2 }
  0x3d   : > { %vm616_vm9 = vcmp.gt.f32.partialorder %v3098_v30, 0.0  ;;  %vm617_vm13 = vcmp.gt.f32.partialorder %v3101_v33, 0.0  ;;  %v2474_v21 = vld [vmem:[%s3335_s10] ss:$0 sm:$0xff]  ;;  %v1288_v33 = vld [vmem:[%s3337_s12 + $0x8] sm:$0xff]  ;;  %s3283_s6 = scalar_lea.hbm %s3342_s17, %s2511_s21  ;;  %s2333_s28 = scalar_lea.sflag [#allocation3], %s594_s18 }
  0x3e   : > { %v1287_v30 = vld [vmem:[%s3337_s12] sm:$0xff]  ;;  %s2810_s19 = scalar_lea.vmem %s3285_s2, 16  ;;  %s2814_s23 = sshll.u32 %s2883_s22, 4  ;;  %s2815_s23 = int_to_ptr.vmem [resolvable:$false] %s2814_s23 }
  0x3f   : > { %p2811_p9 = scmp.ne.s32.totalorder %s3285_s2, %s2810_s19  ;;  %p2817_p13 = scmp.lt.s32.totalorder %s3285_s2, %s2815_s23 }
  0x41   : > { %p2812_p10 = pnand %p2811_p9, %p3012_p5 }
  0x43   : > { %p2813_p12 = pneg %p2812_p10 }
 0x10d   : > { %v2568_v6 = vpop.f32.mrb[0].mxu1 }
 0x10e   : > { %v707_v7 = vpop.f32.mrb[1].mxu1  ;;  %v723_v11 = vmul.f32 %v2568_v6, %v2460_v5 }
 0x10f   : > { %v2670_v8 = vpack.c.bf16 %v2568_v6, %v707_v7  ;;  %v722_v10 = vmul.f32 %v2460_v5, %v707_v7 }
 0x110   : > { %v729_v13 = vsel %vm728_vm8, %v723_v11, 0.0 }
 0x111   : > { %2672 = vmatpush3.bf16.xpose.msk.msra.mxu1 %vm2671_vm5, %v2670_v8  ;;  %v725_v12 = vsel %vm724_vm3, %v722_v10, 0.0  ;;  %vm1061_vm5 = vcmask 44032  }
 0x112   : > { %2675 = vmatprep.subr.msk.bf16.mxu1 %vm3066_vm7, %v2670_v8  ;;  %726 = vadd.xlane.f32.xlu0 %v725_v12 }
 0x116   : > { %730 = vadd.xlane.f32.xlu0 %v729_v13 }
 0x118   : > { %2574 = vmatmul.mubr.msk.f32.vlgmr.msra.gmra.mrb[2].mxu1 %vm724_vm3, %v627_v14 }
 0x119   : > { %2678 = vmatpush3.bf16.msk.msra.mxu1 %vm3066_vm7, %v2670_v8 }
 0x11a   : > { %2583 = vmatprep.subr.msk.mxu1 %vm865_vm4, %v961_v60 }
 0x19f   : > { %v727_v17 = vpop.xlane.xlu0 %726 }
 0x1a3   : > { %v731_v27 = vpop.xlane.xlu0 %730 }
 0x1eb   : > { %v807_v22 = vpop.f32.mrb[2].mxu1 }
 0x1ec   : > { %v814_v25 = vrot.slane %v807_v22, %v813_v18  ;;  %v2575_v26 = vpop.f32.mrb[3].mxu1 }
 0x1ee   : > { %v815_v28 = vadd.f32 %v814_v25, %v727_v17  ;;  %v816_v29 = vadd.f32 %v814_v25, %v731_v27 }
 0x1f0   : > { %v817_v31 = vadd.f32 %v815_v28, %v624_v23  ;;  %v818_v32 = vadd.f32 %v816_v29, %v625_v24  ;;  %v962_v29 = vld [vmem:[%s3334_s9] sm:$0x1] }
 0x1f2   : > { %vm819_vm10 = vcmp.gt.f32.partialorder %v817_v31, 0.0  ;;  %v821_v34 = vmul.f32 0.2, %v817_v31  ;;  %vm820_vm11 = vcmp.gt.f32.partialorder %v818_v32, 0.0  ;;  %v822_v35 = vmul.f32 0.2, %v818_v32 }
 0x1f4   : > { %v823_v36 = vsel %vm819_vm10, %v817_v31, %v821_v34  ;;  %v824_v37 = vsel %vm820_vm11, %v818_v32, %v822_v35  ;;  %v958_v31 = vstv %s2470_s4  ;;  %vm1377_vm10 = vcmask 1041408  }
 0x1f5   : > { %v825_v38 = vsel %vm616_vm9, %v823_v36, -1e+30  ;;  %v826_v40 = vsel %vm617_vm13, %v824_v37, -1e+30  ;;  %v959_v34 = vmul.f32 %v958_v31, %v3086_v19  ;;  %v960_v35 = vmul.f32 %v958_v31, %v3088_v20  ;;  %v1291_v31 = vld [vmem:[%s3337_s12 + $0x20] sm:$0xff] }
 0x1f6   : > { %v828_v39 = vsel %vm827_vm12, %v825_v38, -inf  ;;  %v832_v41 = vsel %vm831_vm14, %v826_v40, -inf }
 0x1f7   : > { %829 = vmax.xlane.f32.xlu1 %v828_v39 }
 0x1fb   : > { %833 = vmax.xlane.f32.xlu1 %v832_v41 }
 0x284   : > { %v830_v42 = vpop.xlane.xlu1 %829 }
 0x285   : > { %v835_v43 = vsub.f32 %v825_v38, %v830_v42 }
 0x287   : > { %v837_v44 = vmul.f32 1.442695, %v835_v43 }
 0x288   : > { %v834_v45 = vpop.xlane.xlu1 %833 }
 0x289   : > { %2769 = vpow2.f32 %v837_v44  ;;  %v836_v46 = vsub.f32 %v826_v40, %v834_v45 }
 0x28b   : > { %v839_v47 = vmul.f32 1.442695, %v836_v46 }
 0x28d   : > { %2771 = vpow2.f32 %v839_v47 }
 0x293   : > { %v2770_v48 = vpop.eup %2769 }
 0x294   : > { %v841_v49 = vsel %vm616_vm9, %v2770_v48, 0.0 }
 0x295   : > { %v843_v50 = vsel %vm827_vm12, %v841_v49, 0.0 }
 0x296   : > { %844 = vadd.xlane.f32.xlu0 %v843_v50 }
 0x297   : > { %v2772_v51 = vpop.eup %2771 }
 0x298   : > { %v842_v52 = vsel %vm617_vm13, %v2772_v51, 0.0 }
 0x299   : > { %v846_v53 = vsel %vm831_vm14, %v842_v52, 0.0 }
 0x29a   : > { %847 = vadd.xlane.f32.xlu1 %v846_v53 }
 0x323   : > { %v845_v54 = vpop.xlane.xlu0 %844 }
 0x324   : > { %2773 = vrcp.f32 %v845_v54 }
 0x327   : > { %v848_v55 = vpop.xlane.xlu1 %847 }
 0x328   : > { %2775 = vrcp.f32 %v848_v55 }
 0x32e   : > { %v2774_v56 = vpop.eup %2773 }
 0x32f   : > { %v851_v57 = vmul.f32 %v2774_v56, %v841_v49 }
 0x331   : > { %2580 = vmatprep.mubr.msk.f32.mxu1 %vm827_vm12, %v851_v57 }
 0x332   : > { %v2776_v58 = vpop.eup %2775 }
 0x333   : > { %v852_v59 = vmul.f32 %v2776_v58, %v842_v52 }
 0x335   : > { %2581 = vmatmul.mubr.msk.f32.vlgmr.msra.gmra.mrb[4].mxu1 %vm827_vm12, %v852_v59 }
 0x336   : > { %2584 = vmatpush3.msk.msra.mxu1 %vm865_vm4, %v961_v60 }
 0x337   : > { %2679 = vmatprep.subr.bf16.mxu1 %v2879_v3 }
 0x408   : > { %v2582_v62 = vpop.f32.mrb[4].mxu1 }
 0x409   : > { %v940_v63 = vadd.f32 %v2582_v62, %v2464_v61  ;;  %v934_v0 = vpop.f32.mrb[5].mxu1 }
 0x40a   : > { %v935_v1 = vadd.f32 %v2464_v61, %v934_v0 }
 0x40b   : > { %v947_v2 = vmul.f32 1.442695, %v940_v63  ;;  %vm944_vm15 = vcmp.gt.f32.partialorder %v940_v63, 0.0 }
 0x40c   : > { %v945_v5 = vmul.f32 1.442695, %v935_v1  ;;  %vm943_vm0 = vcmp.gt.f32.partialorder %v935_v1, 0.0 }
 0x40d   : > { %2777 = vpow2.f32 %v947_v2  ;;  %v1378_v2 = vrot.slane %v1287_v30, 6 }
 0x40e   : > { %2779 = vpow2.f32 %v945_v5  ;;  %v1379_v5 = vrot.slane %v1288_v33, 6 }
 0x417   : > { %v2778_v6 = vpop.eup %2777 }
 0x418   : > { %v2780_v7 = vpop.eup %2779  ;;  %v2469_v8 = vadd.f32 -1.0, %v2778_v6  ;;  %v1380_v6 = vsel %vm1377_vm10, %v1378_v2, %v1379_v5 }
 0x419   : > { %v2468_v10 = vadd.f32 -1.0, %v2780_v7  ;;  %v2478_v7 = vld [vmem:[%s3336_s11] ss:$0 sm:$0xff] }
 0x41a   : > { %v952_v11 = vmul.f32 1.6732632, %v2469_v8 }
 0x41b   : > { %v951_v12 = vmul.f32 1.6732632, %v2468_v10 }
 0x41c   : > { %v954_v13 = vsel %vm944_vm15, %v940_v63, %v952_v11 }
 0x41d   : > { %v953_v14 = vsel %vm943_vm0, %v935_v1, %v951_v12  ;;  %v956_v17 = vmul.f32 1.050701, %v954_v13 }
 0x41e   : > { %v955_v15 = vmul.f32 1.050701, %v953_v14 }
 0x420   : > { %2585 = vmatprep.mubr.msk.f32.mxu1 %vm724_vm3, %v955_v15  ;;  %v1289_v15 = vld [vmem:[%s3337_s12 + $0x10] sm:$0xff] }
 0x421   : > { %2586 = vmatmul.mubr.msk.f32.vlgmr.msra.gmra.mrb[6].mxu1 %vm724_vm3, %v956_v17  ;;  %v1458_v17 = vrot.slane %v1288_v33, 4 }
 0x422   : > { %2592 = vmatprep.mubr.msk.f32.mxu1 %vm2880_vm2, %v2881_v4 }
 0x4f4   : > { %v2587_v22 = vpop.f32.mrb[6].mxu1 }
 0x4f5   : > { %v1056_v23 = vmul.f32 %v2587_v22, %v2474_v21  ;;  %v1040_v24 = vpop.f32.mrb[7].mxu1 }
 0x4f6   : > { %v1055_v25 = vmul.f32 %v2474_v21, %v1040_v24  ;;  %v2680_v26 = vpack.c.bf16 %v2587_v22, %v1040_v24  ;;  %v1459_v21 = vrot.slane %v1289_v15, 4 }
 0x4f7   : > { %v1062_v27 = vsel %vm1061_vm5, %v1056_v23, 0.0 }
 0x4f8   : > { %1063 = vadd.xlane.f32.xlu1 %v1062_v27  ;;  %2682 = vmatpush3.bf16.xpose.msk.msra.mxu1 %vm2681_vm6, %v2680_v26  ;;  %v1058_v28 = vsel %vm1057_vm1, %v1055_v25, 0.0  ;;  %v1460_v25 = vsel %vm865_vm4, %v1458_v17, %v1459_v21 }
 0x4f9   : > { %2685 = vmatprep.subr.msk.bf16.mxu1 %vm3066_vm7, %v2680_v26  ;;  %1059 = vadd.xlane.f32.xlu0 %v1058_v28 }
 0x4ff   : > { %2593 = vmatmul.mubr.msk.f32.vlgmr.msra.gmra.mrb[8].mxu1 %vm1057_vm1, %v962_v29  ;;  %v1290_v29 = vld [vmem:[%s3337_s12 + $0x18] sm:$0xff] }
 0x500   : > { %2688 = vmatpush3.bf16.msk.msra.mxu1 %vm3066_vm7, %v2680_v26  ;;  %v1537_v26 = vrot.slane %v1289_v15, 2 }
 0x501   : > { %2602 = vmatprep.subr.mxu1 %v2881_v4 }
 0x585   : > { %v1064_v38 = vpop.xlane.xlu1 %1063 }
 0x586   : > { %v1060_v39 = vpop.xlane.xlu0 %1059 }
 0x5d2   : > { %v1140_v32 = vpop.f32.mrb[8].mxu1 }
 0x5d3   : > { %v1147_v36 = vrot.slane %v1140_v32, %v813_v18  ;;  %v2594_v37 = vpop.f32.mrb[9].mxu1  ;;  %v1692_v32 = vrot.slane %v1290_v29, 6 }
 0x5d5   : > { %v1148_v40 = vadd.f32 %v1147_v36, %v1060_v39  ;;  %v1149_v41 = vadd.f32 %v1147_v36, %v1064_v38  ;;  %v1292_v38 = vld [vmem:[%s3337_s12 + $0x28] sm:$0xff] }
 0x5d7   : > { %v1150_v42 = vadd.f32 %v1148_v40, %v959_v34  ;;  %v1151_v43 = vadd.f32 %v1149_v41, %v960_v35  ;;  %v1693_v34 = vrot.slane %v1291_v31, 6  ;;  %v1772_v40 = vrot.slane %v1291_v31, 4 }
 0x5d8   : > { %v1773_v41 = vrot.slane %v1292_v38, 4 }
 0x5d9   : > { %vm1153_vm3 = vcmp.gt.f32.partialorder %v1151_v43, 0.0  ;;  %v1155_v44 = vmul.f32 0.2, %v1151_v43  ;;  %vm1152_vm8 = vcmp.gt.f32.partialorder %v1150_v42, 0.0  ;;  %v1154_v45 = vmul.f32 0.2, %v1150_v42 }
 0x5da   : > { %v1694_v37 = vsel %vm1377_vm10, %v1692_v32, %v1693_v34 }
 0x5db   : > { %v1157_v46 = vsel %vm1153_vm3, %v1151_v43, %v1155_v44  ;;  %v1156_v47 = vsel %vm1152_vm8, %v1150_v42, %v1154_v45  ;;  %v1774_v43 = vsel %vm865_vm4, %v1772_v40, %v1773_v41  ;;  %v1851_v44 = vrot.slane %v1292_v38, 2 }
 0x5dc   : > { %v1159_v19 = vsel %vm617_vm13, %v1157_v46, -1e+30  ;;  %v1158_v16 = vsel %vm616_vm9, %v1156_v47, -1e+30 }
 0x5dd   : > { %v1163_v18 = vsel %vm831_vm14, %v1159_v19, -inf  ;;  %v1160_v20 = vsel %vm827_vm12, %v1158_v16, -inf }
 0x5de   : > { %1164 = vmax.xlane.f32.xlu1 %v1163_v18  ;;  %1161 = vmax.xlane.f32.xlu0 %v1160_v20  ;;  %v1294_v20 = vld [vmem:[%s3337_s12 + $0x38] sm:$0xff] }
 0x66b   : > { %v1165_v48 = vpop.xlane.xlu1 %1164  ;;  %v1162_v49 = vpop.xlane.xlu0 %1161 }
 0x66c   : > { %v1167_v50 = vsub.f32 %v1159_v19, %v1165_v48  ;;  %v1166_v51 = vsub.f32 %v1158_v16, %v1162_v49  ;;  %v1293_v16 = vld [vmem:[%s3337_s12 + $0x30] sm:$0xff]  ;;  %v2007_v49 = vrot.slane %v1294_v20, 6 }
 0x66d   : > { %v2006_v48 = vrot.slane %v1293_v16, 6 }
 0x66e   : > { %v1170_v52 = vmul.f32 1.442695, %v1167_v50  ;;  %v1168_v53 = vmul.f32 1.442695, %v1166_v51 }
 0x670   : > { %2781 = vpow2.f32 %v1170_v52  ;;  %v2008_v52 = vsel %vm1377_vm10, %v2006_v48, %v2007_v49 }
 0x671   : > { %2783 = vpow2.f32 %v1168_v53  ;;  %v1295_v53 = vld [vmem:[%s3337_s12 + $0x40] sm:$0xff] }
 0x67a   : > { %v2782_v54 = vpop.eup %2781 }
 0x67b   : > { %v2784_v55 = vpop.eup %2783  ;;  %v1173_v56 = vsel %vm617_vm13, %v2782_v54, 0.0  ;;  %v2086_v54 = vrot.slane %v1294_v20, 4 }
 0x67c   : > { %v1177_v57 = vsel %vm831_vm14, %v1173_v56, 0.0  ;;  %v1172_v58 = vsel %vm616_vm9, %v2784_v55, 0.0  ;;  %vm1300_vm9 = vcmask 1045504   ;;  %v2087_v55 = vrot.slane %v1295_v53, 4 }
 0x67d   : > { %1178 = vadd.xlane.f32.xlu1 %v1177_v57  ;;  %v1174_v59 = vsel %vm827_vm12, %v1172_v58, 0.0  ;;  %2608 = vmatpush3.msk.msra.mxu0 %vm1300_vm9, %v1380_v6 }
 0x67e   : > { %1175 = vadd.xlane.f32.xlu0 %v1174_v59  ;;  %2612 = vmatprep.subr.mxu0 %v2881_v4  ;;  %v2088_v57 = vsel %vm865_vm4, %v2086_v54, %v2087_v55 }
 0x70a   : > { %v1179_v60 = vpop.xlane.xlu1 %1178 }
 0x70b   : > { %2785 = vrcp.f32 %v1179_v60  ;;  %v1176_v61 = vpop.xlane.xlu0 %1175 }
 0x70c   : > { %2787 = vrcp.f32 %v1176_v61  ;;  %v2248_v61 = vld [vmem:[%s3339_s14] sm:$0xff] }
 0x715   : > { %v2786_v62 = vpop.eup %2785 }
 0x716   : > { %v2788_v63 = vpop.eup %2787  ;;  %v1183_v0 = vmul.f32 %v2786_v62, %v1173_v56  ;;  %v2249_v62 = vld [vmem:[%s3339_s14 + $0x8] sm:$0xf] }
 0x717   : > { %v1182_v1 = vmul.f32 %v2788_v63, %v1172_v58  ;;  %v2165_v58 = vrot.slane %v1295_v53, 2  ;;  %v2690_v63 = vpack.c.bf16 %v2249_v62, %v2248_v61 }
 0x719   : > { %2599 = vmatprep.mubr.msk.f32.mxu1 %vm827_vm12, %v1182_v1 }
 0x71a   : > { %2600 = vmatmul.mubr.msk.f32.vlgmr.msra.gmra.mrb[10].mxu1 %vm827_vm12, %v1183_v0 }
 0x71b   : > { %2604 = vmatprep.mubr.msk.f32.mxu1 %vm2880_vm2, %v2881_v4  ;;  %2603 = vmatpush3.msk.msra.mxu1 %vm1300_vm9, %v1287_v30 }
 0x71c   : > { %2689 = vmatprep.subr.bf16.mxu1 %v2879_v3 }
 0x7ed   : > { %v2601_v8 = vpop.f32.mrb[10].mxu1 }
 0x7ee   : > { %v1264_v10 = vpop.f32.mrb[11].mxu1  ;;  %v1270_v35 = vadd.f32 %v2601_v8, %v2478_v7 }
 0x7ef   : > { %v1265_v11 = vadd.f32 %v2478_v7, %v1264_v10 }
 0x7f0   : > { %v1277_v39 = vmul.f32 1.442695, %v1270_v35  ;;  %vm1274_vm13 = vcmp.gt.f32.partialorder %v1270_v35, 0.0 }
 0x7f1   : > { %v1275_v12 = vmul.f32 1.442695, %v1265_v11  ;;  %vm1273_vm11 = vcmp.gt.f32.partialorder %v1265_v11, 0.0 }
 0x7f3   : > { %2789 = vpow2.f32 %v1275_v12  ;;  %v2327_v12 = vld [vmem:[%s613_s26] sm:$0x1]  ;;  %s2816_s26 = scalar_lea.vmem %s2815_s23, 32 }
 0x7f4   : > { %2791 = vpow2.f32 %v1277_v39  ;;  %vm2328_vm4 = vcmp.gt.s32.totalorder %v2327_v12, 0  ;;  %p2818_p0 = scmp.lt.s32.totalorder %s2816_s26, %s2810_s19 }
 0x7f6   : > { %p2819_p1 = por %p2818_p0, %p2817_p13 }
 0x7f8   : > { %p2820_p2 = pnand %p2819_p1, %p2813_p12 }
 0x7fd   : > { %v2790_v13 = vpop.eup %2789 }
 0x7fe   : > { %v2482_v14 = vadd.f32 -1.0, %v2790_v13  ;;  %v2792_v46 = vpop.eup %2791  ;;  %v2250_v13 = vld [vmem:[%s3340_s15] sm:$0x1] }
 0x7ff   : > { %v2483_v47 = vadd.f32 -1.0, %v2792_v46 }
 0x800   : > { %v1281_v3 = vmul.f32 1.6732632, %v2482_v14 }
 0x801   : > { %v1282_v18 = vmul.f32 1.6732632, %v2483_v47 }
 0x802   : > { %v1283_v22 = vsel %vm1273_vm11, %v1265_v11, %v1281_v3 }
 0x803   : > { %v1285_v23 = vmul.f32 1.050701, %v1283_v22  ;;  %v1284_v50 = vsel %vm1274_vm13, %v1270_v35, %v1282_v18 }
 0x804   : > { %v1286_v51 = vmul.f32 1.050701, %v1284_v50 }
 0x805   : > { %2605 = vmatmul.mubr.msk.f32.vlgmr.msra.gmra.mrb[12].mxu1 %vm1057_vm1, %v1285_v23  ;;  %v1375_v24 = vrot.slane %v1285_v23, 1  ;;  %v1456_v27 = vrot.slane %v1285_v23, 2  ;;  %v1536_v28 = vrot.slane %v1285_v23, 3  ;;  %v1613_v36 = vrot.slane %v1285_v23, 4 }
 0x806   : > { %2666 = vmatprep.mubr.msk.f32.mxu1 %vm2880_vm2, %v2881_v4  ;;  %v1690_v42 = vrot.slane %v1285_v23, 5  ;;  %v1770_v45 = vrot.slane %v1285_v23, 6  ;;  %v1850_v19 = vrot.slane %v1285_v23, 7  ;;  %v2004_v56 = vrot.slane %v1286_v51, 1  ;;  %2692 = vmatpush3.bf16.msk.msra.mxu1 %vm3066_vm7, %v2690_v63 }
 0x807   : > { %2610 = vmatmul.mubr.msk.f32.vlgmr.msra.gmra.mrb[0].mxu0 %vm1057_vm1, %v1375_v24  ;;  %v2084_v59 = vrot.slane %v1286_v51, 2  ;;  %v2164_v60 = vrot.slane %v1286_v51, 3  ;;  %vm2330_vm7 = vcmask 32768  }
 0x808   : > { %2613 = vmatpush3.msk.msra.mxu0 %vm1300_vm9, %v1460_v25  ;;  %2614 = vmatprep.mubr.msk.f32.mxu0 %vm2880_vm2, %v2881_v4 }
 0x809   : > { %2617 = vmatprep.subr.mxu0 %v2881_v4 }
 0x80f   : > { %2615 = vmatmul.mubr.msk.f32.vlgmr.msra.gmra.mrb[0].mxu0 %vm1057_vm1, %v1456_v27 }
 0x810   : > { %2618 = vmatpush3.msk.msra.mxu0 %vm1300_vm9, %v1537_v26  ;;  %2619 = vmatprep.mubr.msk.f32.mxu0 %vm2880_vm2, %v2881_v4 }
 0x811   : > { %2622 = vmatprep.subr.mxu0 %v2881_v4 }
 0x817   : > { %2620 = vmatmul.mubr.msk.f32.vlgmr.msra.gmra.mrb[0].mxu0 %vm1057_vm1, %v1536_v28 }
 0x818   : > { %2623 = vmatpush3.msk.msra.mxu0 %vm1300_vm9, %v1290_v29  ;;  %2624 = vmatprep.mubr.msk.f32.mxu0 %vm2880_vm2, %v2881_v4 }
 0x819   : > { %2627 = vmatprep.subr.mxu0 %v2881_v4 }
 0x81f   : > { %2625 = vmatmul.mubr.msk.f32.vlgmr.msra.gmra.mrb[0].mxu0 %vm1057_vm1, %v1613_v36 }
 0x820   : > { %2628 = vmatpush3.msk.msra.mxu0 %vm1300_vm9, %v1694_v37  ;;  %2629 = vmatprep.mubr.msk.f32.mxu0 %vm2880_vm2, %v2881_v4 }
 0x821   : > { %2632 = vmatprep.subr.mxu0 %v2881_v4 }
 0x827   : > { %2630 = vmatmul.mubr.msk.f32.vlgmr.msra.gmra.mrb[0].mxu0 %vm1057_vm1, %v1690_v42 }
 0x828   : > { %2633 = vmatpush3.msk.msra.mxu0 %vm1300_vm9, %v1774_v43  ;;  %2634 = vmatprep.mubr.msk.f32.mxu0 %vm2880_vm2, %v2881_v4 }
 0x829   : > { %2637 = vmatprep.subr.mxu0 %v2881_v4 }
 0x82f   : > { %2635 = vmatmul.mubr.msk.f32.vlgmr.msra.gmra.mrb[0].mxu0 %vm1057_vm1, %v1770_v45 }
 0x830   : > { %2638 = vmatpush3.msk.msra.mxu0 %vm1300_vm9, %v1851_v44  ;;  %2639 = vmatprep.mubr.msk.f32.mxu0 %vm2880_vm2, %v2881_v4 }
 0x831   : > { %2642 = vmatprep.subr.mxu0 %v2881_v4 }
 0x837   : > { %2640 = vmatmul.mubr.msk.f32.vlgmr.msra.gmra.mrb[0].mxu0 %vm1057_vm1, %v1850_v19 }
 0x838   : > { %2643 = vmatpush3.msk.msra.mxu0 %vm1300_vm9, %v1293_v16  ;;  %2644 = vmatprep.mubr.msk.f32.mxu0 %vm2880_vm2, %v2881_v4 }
 0x839   : > { %2647 = vmatprep.subr.mxu0 %v2881_v4 }
 0x83f   : > { %2645 = vmatmul.mubr.msk.f32.vlgmr.msra.gmra.mrb[0].mxu0 %vm1057_vm1, %v1286_v51 }
 0x840   : > { %2648 = vmatpush3.msk.msra.mxu0 %vm1300_vm9, %v2008_v52  ;;  %2649 = vmatprep.mubr.msk.f32.mxu0 %vm2880_vm2, %v2881_v4 }
 0x841   : > { %2652 = vmatprep.subr.mxu0 %v2881_v4 }
 0x847   : > { %2650 = vmatmul.mubr.msk.f32.vlgmr.msra.gmra.mrb[0].mxu0 %vm1057_vm1, %v2004_v56 }
 0x848   : > { %2653 = vmatpush3.msk.msra.mxu0 %vm1300_vm9, %v2088_v57  ;;  %2654 = vmatprep.mubr.msk.f32.mxu0 %vm2880_vm2, %v2881_v4 }
 0x849   : > { %2657 = vmatprep.subr.mxu0 %v2881_v4 }
 0x84f   : > { %2655 = vmatmul.mubr.msk.f32.vlgmr.msra.gmra.mrb[0].mxu0 %vm1057_vm1, %v2084_v59 }
 0x850   : > { %2658 = vmatpush3.msk.msra.mxu0 %vm1300_vm9, %v2165_v58  ;;  %2659 = vmatprep.mubr.msk.f32.mxu0 %vm2880_vm2, %v2881_v4  ;;  %v1296_v4 = vld [vmem:[%s3338_s13] sm:$0x1] }
 0x857   : > { %2660 = vmatmul.mubr.msk.f32.vlgmr.msra.gmra.mrb[0].mxu0 %vm1057_vm1, %v2164_v60 }
 0x8d8   : > { %v1370_v0 = vpop.f32.mrb[12].mxu1 }
 0x8d9   : > { %v2606_v1 = vpop.f32.mrb[13].mxu1  ;;  %v1374_v30 = vadd.f32 %v1370_v0, %v1296_v4 }
 0x92a   : > { %v2236_v33 = vpop.f32.mrb[0].mxu0 }
 0x92b   : > { %v2694_v2 = vadd.f32 %v2236_v33, %v1374_v30  ;;  %v2661_v5 = vpop.f32.mrb[1].mxu0 }
 0x92d   : > { %v2242_v6 = vmul.f32 1.442695, %v2694_v2  ;;  %vm2241_vm2 = vcmp.gt.f32.partialorder %v2694_v2, 0.0 }
 0x92f   : > { %2793 = vpow2.f32 %v2242_v6 }
 0x939   : > { %v2794_v7 = vpop.eup %2793 }
 0x93a   : > { %v2508_v8 = vadd.f32 -1.0, %v2794_v7 }
 0x93c   : > { %v2245_v10 = vmul.f32 1.6732632, %v2508_v8 }
 0x93e   : > { %v2246_v9 = vsel %vm2241_vm2, %v2694_v2, %v2245_v10 }
 0x93f   : > { %v2247_v11 = vmul.f32 1.050701, %v2246_v9 }
 0x941   : > { %2667 = vmatmul.mubr.msk.f32.vlgmr.msra.gmra.mrb[14].mxu1 %vm827_vm12, %v2247_v11 }
 0xa14   : > { %v2323_v14 = vpop.f32.mrb[14].mxu1 }
 0xa15   : > { %v2324_v15 = vadd.f32 %v2323_v14, %v2250_v13  ;;  %v2668_v3 = vpop.f32.mrb[15].mxu1 }
 0xa17   : > { %v2329_v17 = vsel %vm2328_vm4, %v2324_v15, -inf }
 0xa18   : > { %2331 = vst.msk [vmem:[%s595_s30] sm:$0x1] %vm2330_vm7, %v2329_v17 }
 0xa19   : > { %2823 = shalt.err (!%p2820_p2)
}
 0xa1a   : > { %s2824_s3 = scalar_lea.hbm %s3283_s6, 16  ;;  %s2828_s29 = scalar_lea.hbm %s3342_s17, 32 }
 0xa1b   : > { %p2825_p3 = scmp.ne.s32.totalorder %s3283_s6, %s2824_s3  ;;  %p2829_p8 = scmp.lt.u32.totalorder %s3283_s6, %s3342_s17 }
 0xa1c   : > { %p2830_p11 = scmp.lt.u32.totalorder %s2828_s29, %s2824_s3  ;;  %p2832_p10 = scmp.lt.u32.totalorder %s2824_s3, %s3283_s6 }
 0xa1d   : > { %p2826_p4 = pnand %p2825_p3, %p3012_p5 }
 0xa1e   : > { %p2831_p9 = por %p2830_p11, %p2829_p8 }
 0xa1f   : > { %p2827_p7 = pneg %p2826_p4 }
 0xa20   : > { %p2833_p12 = por %p2832_p10, %p2831_p9 }
 0xa22   : > { %p2834_p13 = pnand %p2833_p12, %p2827_p7 }
 0xa24   : > { %2837 = shalt.err (!%p2834_p13)
}
 0xa25   : > { %2719 = dma.vmem_to_hbm [thread:$0]  (%p3012_p5), %s3285_s2, 16, %s3283_s6, %s2333_s28  }
 0xa26 PF: > { %p2731_p0 = scmp.ge.s32.totalorder %s2876_s27, 2  ;;  %s2357_s30 = sand.u32 1, %s2864_s24  }
 0xa27   : > { %s2358_s19 = scalar_lea.sflag [#allocation3], %s2357_s30 }
 0xa28   : > { %p2726_p1 = pnand %p2731_p0, %p3016_p6 }
 0xa2a   : > { %2859 = dma.done.wait (!%p2726_p1), %s2358_s19, 16  }
 0xa2b   : > { %2861 = vsyncadd (!%p2726_p1), %s2358_s19, 4294967280  ;;  %s3365_s22 = sld [smem:[#allocation8_spill]]  ;;  %s3366_s26 = sld [smem:[#allocation9_spill]] }
 0xa2c   : > { %p28_p2 = scmp.ge.s32.totalorder %s2999_s0, 4   ;;  %s3367_s24 = smov %s2868_s25 }
 0xa2d   : > { %s3369_s27 = smov %s2999_s0 }
 0xa2e   :  { %30 = sbr.rel (!%p28_p2) target bundleno = 12 (0xc), region = 137 }
 0xa31   : > { %s3368_s25 = smov %s3365_s22 }
 0xa35   :  { %2362 = vsyncpa [#allocation3], 1 }
 0xa36   :  { %2364 = vsyncpa [#allocation3 + $0x1], 1 }
 0xa37   :  { %2365 = vsyncpa [#allocation4], 1 }
 0xa38   :  { %2367 = vsyncpa [#allocation4 + $0x1], 1 }

</bundles_post_ra>
